<compile_context>
chip_gen: v5e
topology: v5e:2x2
jax: 0.10.0
libtpu: 0.0.40
codegen_flags: <defaults>
</compile_context>

<pallas_src>
import jax
import jax.numpy as jnp
from jax.experimental import pallas as pl
from jax.experimental.pallas import tpu as pltpu


def mlp_kernel(x_ref, w1_ref, b1_ref, w2_ref, b2_ref, w3_ref, b3_ref, o_ref):
    # fc1 + ReLU (MXU, f32 accumulate; x/w1 may be bf16)
    h1 = jnp.dot(x_ref[...], w1_ref[...], preferred_element_type=jnp.float32)
    h1 = jnp.maximum(h1 + b1_ref[...], 0.0)
    # fc2 + ReLU (MXU, f32 accumulate). Cast activations back to the weight
    # dtype so bf16 weights keep the bf16 MXU path (no-op when f32).
    h2 = jnp.dot(h1.astype(w2_ref.dtype), w2_ref[...],
                 preferred_element_type=jnp.float32)
    h2 = jnp.maximum(h2 + b2_ref[...], 0.0)
    # fc3: (TB,64)@(64,1) would use 1/128..1/256 of the MXU lanes, so do it on
    # the VPU (broadcast multiply) + XLU (row reduce). Sigmoid via EUP exp and
    # an exact reciprocal (approx=True possible if ~1e-4 error is OK).
    logit = jnp.sum(h2 * w3_ref[...], axis=-1, keepdims=True) + b3_ref[...]
    o_ref[...] = pl.reciprocal(1.0 + jnp.exp(-logit)).astype(o_ref.dtype)


def _round_up(x, m):
    return -(-x // m) * m


def _pick_batch_tile(batch, feat, itemsize):
    """VMEM- and MXU-aware batch tile.

    - batch <= 256: one sublane-aligned tile (overhead regime is unavoidable).
    - otherwise: target ~4 MiB for the streamed x buffer (double-buffered by
      Pallas), clamp to [128, 4096] rows (multiple of 128 so MXU rows fill and
      the lane-padded (tb,1) out block + f32 h1/h2 temporaries stay small),
      and guarantee >= 2 grid steps so v7x's two TensorCores both get work.
    """
    if batch <= 256:
        return max(8, _round_up(batch, 8))
    target_x_bytes = 4 << 20
    tb = (target_x_bytes // max(1, feat * itemsize)) // 128 * 128
    tb = max(128, min(tb, 4096))
    tb = min(tb, _round_up(-(-batch // 2), 128))   # >= 2 tiles for v7x megacore
    return tb


def binary_classifier_forward(x, params, *, compute_dtype=jnp.bfloat16):
    """x: (B, input_size). params: w1 (in,128), b1 (1,128), w2 (128,64),
    b2 (1,64), w3 (1,64) [PyTorch (out,in) layout], b3 (1,1).
    x/w1/w2 are cast to `compute_dtype` (bf16 default); accumulation is f32."""
    w1, b1, w2, b2, w3, b3 = (params["w1"], params["b1"], params["w2"],
                              params["b2"], params["w3"], params["b3"])
    B, F = x.shape
    itemsize = jnp.dtype(compute_dtype).itemsize
    x = x.astype(compute_dtype)
    w1 = w1.astype(compute_dtype)
    w2 = w2.astype(compute_dtype)
    # biases / w3 stay f32: they are applied to the f32 accumulators.

    tb = _pick_batch_tile(B, F, itemsize)
    num_tiles = -(-B // tb)   # ragged last block is masked by Pallas (no pad copy)

    def resident(arr):   # full-array block, same block for every grid step
        return pl.BlockSpec(arr.shape, lambda i: (0, 0))

    # Raise the scoped-VMEM cap only when the double-buffered x tile gets big
    # (very large F); default tiles fit v5e's 16 MiB scoped default.
    cp_kwargs = dict(dimension_semantics=("parallel",))   # v7x dual-core sharding
    x_stream_bytes = 2 * tb * F * itemsize
    if x_stream_bytes > (6 << 20):
        cp_kwargs["vmem_limit_bytes"] = int(min(2 * x_stream_bytes + (8 << 20),
                                                48 << 20))

    out = pl.pallas_call(
        mlp_kernel,
        out_shape=jax.ShapeDtypeStruct((B, 1), jnp.float32),
        grid=(num_tiles,),
        in_specs=[
            pl.BlockSpec((tb, F), lambda i: (i, 0)),   # streamed batch tile
            resident(w1), resident(b1),
            resident(w2), resident(b2),
            resident(w3), resident(b3),                # b3 (1,1): tiny, VMEM-resident
        ],
        out_specs=pl.BlockSpec((tb, 1), lambda i: (i, 0)),
        compiler_params=pltpu.CompilerParams(**cp_kwargs),
    )(x, w1, b1, w2, b2, w3, b3)
    return out


def init_params(input_size, key):
    """Deterministic init. w1/w2 pre-transposed (in,out); w3 is (out=1,in=64)."""
    k1, k2, k3, k4, k5, k6 = jax.random.split(key, 6)
    s = 0.1
    return {
        "w1": s * jax.random.normal(k1, (input_size, 128), jnp.float32),
        "b1": s * jax.random.normal(k2, (1, 128), jnp.float32),
        "w2": s * jax.random.normal(k3, (128, 64), jnp.float32),
        "b2": s * jax.random.normal(k4, (1, 64), jnp.float32),
        "w3": s * jax.random.normal(k5, (1, 64), jnp.float32),
        "b3": s * jax.random.normal(k6, (1, 1), jnp.float32),
    }


def reference_forward(x, p):
    h1 = jnp.maximum(x @ p["w1"] + p["b1"], 0.0)
    h2 = jnp.maximum(h1 @ p["w2"] + p["b2"], 0.0)
    return jax.nn.sigmoid(h2 @ p["w3"].T + p["b3"])


if __name__ == "__main__":
    key = jax.random.PRNGKey(0)
    kx, kp = jax.random.split(key)

    batch, input_size = 8, 32
    x = jax.random.normal(kx, (batch, input_size), jnp.float32)
    params = init_params(input_size, kp)
    ref = reference_forward(x, params)

    # f32 path: bit-for-bit-ish check against the pure-JAX reference.
    out_f32 = jax.block_until_ready(
        binary_classifier_forward(x, params, compute_dtype=jnp.float32))
    assert out_f32.shape == (batch, 1)
    assert jnp.allclose(out_f32, ref, atol=1e-5, rtol=1e-5), "f32 mismatch"

    # Default bf16 path (f32 accumulation): looser tolerance.
    out_bf16 = jax.block_until_ready(binary_classifier_forward(x, params))
    assert out_bf16.shape == (batch, 1)
    assert jnp.allclose(out_bf16, ref, atol=2e-2), "bf16 mismatch"

    # Tiled + ragged-last-block path (B=640 -> tb=384, grid=2, no pad copy).
    x2 = jax.random.normal(jax.random.PRNGKey(1), (640, input_size), jnp.float32)
    ref2 = reference_forward(x2, params)
    out2_f32 = jax.block_until_ready(
        binary_classifier_forward(x2, params, compute_dtype=jnp.float32))
    assert out2_f32.shape == (640, 1)
    assert jnp.allclose(out2_f32, ref2, atol=1e-5, rtol=1e-5), "tiled f32 mismatch"
    out2_bf16 = jax.block_until_ready(binary_classifier_forward(x2, params))
    assert jnp.allclose(out2_bf16, ref2, atol=2e-2), "tiled bf16 mismatch"

    print("KERNEL_OK")
</pallas_src>

<mosaic_0001>
module attributes {stable_mosaic.version = 11 : i64} {
  func.func @mlp_kernel(%arg0: i32, %arg1: memref<8x32xf32, #tpu.memory_space<vmem>>, %arg2: memref<32x128xf32, #tpu.memory_space<vmem>>, %arg3: memref<1x128xf32, #tpu.memory_space<vmem>>, %arg4: memref<128x64xf32, #tpu.memory_space<vmem>>, %arg5: memref<1x64xf32, #tpu.memory_space<vmem>>, %arg6: memref<1x64xf32, #tpu.memory_space<vmem>>, %arg7: memref<1x1xf32, #tpu.memory_space<vmem>>, %arg8: memref<8x1xf32, #tpu.memory_space<vmem>>) attributes {dimension_semantics = [#tpu.dimension_semantics<parallel>], iteration_bounds = array<i64: 1>, scalar_prefetch = 0 : i64, scratch_operands = 0 : i64, tpu.core_type = #tpu.core_type<tc>, window_params = [{transform_indices = @transform_0, window_bounds = array<i64: 8, 32>}, {pipeline_mode = #tpu.pipeline_mode<synchronous>, transform_indices = @transform_1, window_bounds = array<i64: 32, 128>}, {pipeline_mode = #tpu.pipeline_mode<synchronous>, transform_indices = @transform_2, window_bounds = array<i64: 1, 128>}, {pipeline_mode = #tpu.pipeline_mode<synchronous>, transform_indices = @transform_3, window_bounds = array<i64: 128, 64>}, {pipeline_mode = #tpu.pipeline_mode<synchronous>, transform_indices = @transform_4, window_bounds = array<i64: 1, 64>}, {pipeline_mode = #tpu.pipeline_mode<synchronous>, transform_indices = @transform_5, window_bounds = array<i64: 1, 64>}, {pipeline_mode = #tpu.pipeline_mode<synchronous>, transform_indices = @transform_6, window_bounds = array<i64: 1, 1>}, {transform_indices = @transform_7, window_bounds = array<i64: 8, 1>}]} {
    %c0 = arith.constant 0 : index
    %c0_0 = arith.constant 0 : index
    %0 = vector.load %arg1[%c0, %c0_0] : memref<8x32xf32, #tpu.memory_space<vmem>>, vector<8x32xf32>
    %c0_1 = arith.constant 0 : index
    %c0_2 = arith.constant 0 : index
    %1 = vector.load %arg2[%c0_1, %c0_2] : memref<32x128xf32, #tpu.memory_space<vmem>>, vector<32x128xf32>
    %cst = arith.constant dense<0.000000e+00> : vector<8x128xf32>
    %2 = tpu.matmul %0, %1, %cst {dimension_numbers = #tpu.dot_dimension_numbers<[1], [0], [0], [1], [0, 0, 1, 1], [], []>} : vector<8x32xf32>, vector<32x128xf32>, vector<8x128xf32> -> vector<8x128xf32>
    %c0_3 = arith.constant 0 : index
    %c0_4 = arith.constant 0 : index
    %3 = vector.load %arg3[%c0_3, %c0_4] : memref<1x128xf32, #tpu.memory_space<vmem>>, vector<1x128xf32>
    %4 = vector.broadcast %3 : vector<1x128xf32> to vector<8x128xf32>
    %5 = arith.addf %2, %4 : vector<8x128xf32>
    %cst_5 = arith.constant 0.000000e+00 : f32
    %6 = vector.broadcast %cst_5 : f32 to vector<8x128xf32>
    %7 = arith.maximumf %5, %6 : vector<8x128xf32>
    %c0_6 = arith.constant 0 : index
    %c0_7 = arith.constant 0 : index
    %8 = vector.load %arg4[%c0_6, %c0_7] : memref<128x64xf32, #tpu.memory_space<vmem>>, vector<128x64xf32>
    %cst_8 = arith.constant dense<0.000000e+00> : vector<8x64xf32>
    %9 = tpu.matmul %7, %8, %cst_8 {dimension_numbers = #tpu.dot_dimension_numbers<[1], [0], [0], [1], [0, 0, 1, 1], [], []>} : vector<8x128xf32>, vector<128x64xf32>, vector<8x64xf32> -> vector<8x64xf32>
    %c0_9 = arith.constant 0 : index
    %c0_10 = arith.constant 0 : index
    %10 = vector.load %arg5[%c0_9, %c0_10] : memref<1x64xf32, #tpu.memory_space<vmem>>, vector<1x64xf32>
    %11 = vector.broadcast %10 : vector<1x64xf32> to vector<8x64xf32>
    %12 = arith.addf %9, %11 : vector<8x64xf32>
    %cst_11 = arith.constant 0.000000e+00 : f32
    %13 = vector.broadcast %cst_11 : f32 to vector<8x64xf32>
    %14 = arith.maximumf %12, %13 : vector<8x64xf32>
    %c0_12 = arith.constant 0 : index
    %c0_13 = arith.constant 0 : index
    %15 = vector.load %arg6[%c0_12, %c0_13] : memref<1x64xf32, #tpu.memory_space<vmem>>, vector<1x64xf32>
    %16 = vector.broadcast %15 : vector<1x64xf32> to vector<8x64xf32>
    %17 = arith.mulf %14, %16 : vector<8x64xf32>
    %cst_14 = arith.constant dense<0.000000e+00> : vector<8xf32>
    %18 = vector.multi_reduction <add>, %17, %cst_14 [1] : vector<8x64xf32> to vector<8xf32>
    %19 = vector.shape_cast %18 : vector<8xf32> to vector<8x1xf32>
    %c0_15 = arith.constant 0 : index
    %c0_16 = arith.constant 0 : index
    %20 = vector.load %arg7[%c0_15, %c0_16] : memref<1x1xf32, #tpu.memory_space<vmem>>, vector<1x1xf32>
    %21 = vector.broadcast %20 : vector<1x1xf32> to vector<8x1xf32>
    %22 = arith.addf %19, %21 : vector<8x1xf32>
    %cst_17 = arith.constant 0.000000e+00 : f32
    %23 = vector.broadcast %cst_17 : f32 to vector<8x1xf32>
    %24 = arith.subf %23, %22 : vector<8x1xf32>
    %25 = math.exp %24 : vector<8x1xf32>
    %cst_18 = arith.constant 1.000000e+00 : f32
    %26 = vector.broadcast %cst_18 : f32 to vector<8x1xf32>
    %27 = arith.addf %26, %25 : vector<8x1xf32>
    %28 = tpu.reciprocal %27 : vector<8x1xf32> -> vector<8x1xf32>
    %c0_19 = arith.constant 0 : index
    %c0_20 = arith.constant 0 : index
    %29 = vector.load %arg8[%c0_19, %c0_20] : memref<8x1xf32, #tpu.memory_space<vmem>>, vector<8x1xf32>
    tpu.vector_store %arg8[%c0_19, %c0_20], %28 {strides = array<i32>} : memref<8x1xf32, #tpu.memory_space<vmem>>, vector<8x1xf32>,
    return
  }
  func.func @transform_0(%arg0: i32) -> (i32, i32) {
    %c0_i32 = arith.constant 0 : i32
    %c0_i32_0 = arith.constant 0 : i32
    return %arg0, %c0_i32 : i32, i32
  }
  func.func @transform_1(%arg0: i32) -> (i32, i32) {
    %c0_i32 = arith.constant 0 : i32
    %c0_i32_0 = arith.constant 0 : i32
    %c0_i32_1 = arith.constant 0 : i32
    return %c0_i32, %c0_i32_0 : i32, i32
  }
  func.func @transform_2(%arg0: i32) -> (i32, i32) {
    %c0_i32 = arith.constant 0 : i32
    %c0_i32_0 = arith.constant 0 : i32
    %c0_i32_1 = arith.constant 0 : i32
    return %c0_i32, %c0_i32_0 : i32, i32
  }
  func.func @transform_3(%arg0: i32) -> (i32, i32) {
    %c0_i32 = arith.constant 0 : i32
    %c0_i32_0 = arith.constant 0 : i32
    %c0_i32_1 = arith.constant 0 : i32
    return %c0_i32, %c0_i32_0 : i32, i32
  }
  func.func @transform_4(%arg0: i32) -> (i32, i32) {
    %c0_i32 = arith.constant 0 : i32
    %c0_i32_0 = arith.constant 0 : i32
    %c0_i32_1 = arith.constant 0 : i32
    return %c0_i32, %c0_i32_0 : i32, i32
  }
  func.func @transform_5(%arg0: i32) -> (i32, i32) {
    %c0_i32 = arith.constant 0 : i32
    %c0_i32_0 = arith.constant 0 : i32
    %c0_i32_1 = arith.constant 0 : i32
    return %c0_i32, %c0_i32_0 : i32, i32
  }
  func.func @transform_6(%arg0: i32) -> (i32, i32) {
    %c0_i32 = arith.constant 0 : i32
    %c0_i32_0 = arith.constant 0 : i32
    %c0_i32_1 = arith.constant 0 : i32
    return %c0_i32, %c0_i32_0 : i32, i32
  }
  func.func @transform_7(%arg0: i32) -> (i32, i32) {
    %c0_i32 = arith.constant 0 : i32
    %c0_i32_0 = arith.constant 0 : i32
    return %arg0, %c0_i32 : i32, i32
  }
}

</mosaic_0001>

<bundles_post_ra>
// kernel: tpu_custom_call.1
= control target key start
LH: loop header
LB: loop body
LE: loop exit
PB: predicated region body
PF: predicated region fallthrough
CT: control target
= control target key end

     0   :  { %vm37_vm0 = vcmask 261120   ;;  %vm108_vm1 = vcmask 523264   ;;  %vm135_vm5 = vcmask 7168   ;;  %s268_s1 = inlined_call_operand.vmem [shape: f32[32,128], index: 1, kind: input, shape index: {}]   ;;  %s269_s3 = inlined_call_operand.vmem [shape: f32[128,64], index: 3, kind: input, shape index: {}]   ;;  %s270_s0 = inlined_call_operand.vmem [shape: f32[8,32], index: 0, kind: input, shape index: {}]   ;;  %s271_s2 = inlined_call_operand.vmem [shape: f32[1,128], index: 2, kind: input, shape index: {}]   ;;  %s272_s4 = inlined_call_operand.vmem [shape: f32[1,64], index: 4, kind: input, shape index: {}]   ;;  %s273_s5 = inlined_call_operand.vmem [shape: f32[1,64], index: 5, kind: input, shape index: {}]   ;;  %s274_s6 = inlined_call_operand.<no memory space> [shape: f32[1,1], index: 6, kind: input, shape index: {}]   ;;  %s275_s7 = inlined_call_operand.vmem [shape: f32[8,1], index: 7, kind: output, shape index: {}]  }
   0x1   :  { %v32_v0 = vld [vmem:[%s268_s1 + $0x18] sm:$0xff]  ;;  %v31_v1 = vld [vmem:[%s268_s1 + $0x10] sm:$0xff]  ;;  %v30_v3 = vld [vmem:[%s268_s1 + $0x8] sm:$0xff]  ;;  %v12_v25 = vstv %s274_s6 }
   0x2   :  { %53 = vmatpush.msra.mxu0 %v32_v0  ;;  %v77_v2 = vld [vmem:[%s269_s3 + $0x78] sm:$0xff]  ;;  %v76_v4 = vld [vmem:[%s269_s3 + $0x70] sm:$0xff]  ;;  %v75_v5 = vld [vmem:[%s269_s3 + $0x68] sm:$0xff]  ;;  %13 = vst [vmem:[#allocation2] sm:$0x1] %v12_v25 }
   0x3   :  { %82 = vmatpush.msra.mxu1 %v77_v2  ;;  %v29_v6 = vld [vmem:[%s268_s1] sm:$0xff]  ;;  %v73_v9 = vld [vmem:[%s269_s3 + $0x58] sm:$0xff]  ;;  %v72_v10 = vld [vmem:[%s269_s3 + $0x50] sm:$0xff] }
   0x4   :  { %54 = vmatpush.msra.mxu0 %v31_v1  ;;  %v28_v7 = vld [vmem:[%s270_s0] sm:$0xff]  ;;  %v71_v11 = vld [vmem:[%s269_s3 + $0x48] sm:$0xff]  ;;  %v69_v13 = vld [vmem:[%s269_s3 + $0x38] sm:$0xff] }
   0x5   :  { %83 = vmatpush.msra.mxu1 %v76_v4  ;;  %v74_v8 = vld [vmem:[%s269_s3 + $0x60] sm:$0xff]  ;;  %v68_v14 = vld [vmem:[%s269_s3 + $0x30] sm:$0xff]  ;;  %v67_v15 = vld [vmem:[%s269_s3 + $0x28] sm:$0xff] }
   0x6   :  { %55 = vmatpush.msra.mxu0 %v30_v3  ;;  %v70_v12 = vld [vmem:[%s269_s3 + $0x40] sm:$0xff]  ;;  %v65_v17 = vld [vmem:[%s269_s3 + $0x18] sm:$0xff]  ;;  %v64_v18 = vld [vmem:[%s269_s3 + $0x10] sm:$0xff] }
   0x7   :  { %84 = vmatpush.msra.mxu1 %v75_v5  ;;  %v66_v16 = vld [vmem:[%s269_s3 + $0x20] sm:$0xff]  ;;  %v63_v19 = vld [vmem:[%s269_s3 + $0x8] sm:$0xff] }
   0x8   :  { %56 = vmatpush.msra.mxu0 %v29_v6  ;;  %v62_v20 = vld [vmem:[%s269_s3] sm:$0xff] }
   0x9   :  { %141 = vmatmul.msk.f32.vlgmr.msra.gmra.mxu0 %vm37_vm0, %v28_v7  ;;  %85 = vmatpush.msra.mxu1 %v74_v8  ;;  %v142_v21 = vld [vmem:[%s271_s2] ss:$0 sm:$0xff] }
   0xa   :  { %v143_v26 = vld [vmem:[%s272_s4] ss:$0 sm:$0xff] }
   0xb   :  { %86 = vmatpush.msra.mxu1 %v73_v9  ;;  %v144_v29 = vld [vmem:[%s273_s5] ss:$0 sm:$0xff] }
   0xc   :  { %v145_v33 = vld [vmem:[#allocation2] ss:$0 sm:$0xff] }
   0xd   :  { %87 = vmatpush.msra.mxu1 %v72_v10 }
   0xf   :  { %88 = vmatpush.msra.mxu1 %v71_v11 }
  0x11   :  { %89 = vmatpush.msra.mxu1 %v70_v12 }
  0x13   :  { %90 = vmatpush.msra.mxu1 %v69_v13 }
  0x15   :  { %91 = vmatpush.msra.mxu1 %v68_v14 }
  0x17   :  { %92 = vmatpush.msra.mxu1 %v67_v15 }
  0x19   :  { %93 = vmatpush.msra.mxu1 %v66_v16 }
  0x1b   :  { %94 = vmatpush.msra.mxu1 %v65_v17 }
  0x1d   :  { %95 = vmatpush.msra.mxu1 %v64_v18 }
  0x1f   :  { %96 = vmatpush.msra.mxu1 %v63_v19 }
  0x21   :  { %97 = vmatpush.msra.mxu1 %v62_v20 }
  0x86   :  { %v58_v22 = vpop.f32.mrf.mxu0 }
  0x87   :  { %v59_v23 = vadd.f32 %v142_v21, %v58_v22 }
  0x89   :  { %v61_v24 = vmax.f32 %v59_v23, 0.0 }
  0x8b   :  { %98 = vmatmul.f32.vlgmr.msra.gmra.mxu1 %v61_v24 }
 0x108   :  { %v99_v27 = vpop.f32.mrf.mxu1 }
 0x109   :  { %v100_v28 = vadd.f32 %v143_v26, %v99_v27 }
 0x10b   :  { %v102_v30 = vmax.f32 %v100_v28, 0.0 }
 0x10d   :  { %v107_v31 = vmul.f32 %v144_v29, %v102_v30 }
 0x10f   :  { %v109_v32 = vsel %vm108_vm1, %v107_v31, 0.0 }
 0x110   :  { %110 = vadd.xlane.f32.xlu0 %v109_v32 }
 0x183   :  { %v111_v34 = vpop.xlane.xlu0 %110 }
 0x184   :  { %v116_v35 = vadd.f32 %v145_v33, %v111_v34 }
 0x186   :  { %v117_v36 = vsub.f32 0.0, %v116_v35 }
 0x188   :  { %v118_v37 = vmul.f32 1.442695, %v117_v36 }
 0x18a   :  { %146 = vpow2.f32 %v118_v37 }
 0x190   :  { %v147_v38 = vpop.eup %146 }
 0x191   :  { %v120_v39 = vadd.f32 1.0, %v147_v38 }
 0x193   :  { %148 = vrcp.f32 %v120_v39  ;;  %v132_v43 = vand.u32 2147483648, %v120_v39  ;;  %v130_v45 = vand.u32 2147483647, %v120_v39  ;;  %vm126_vm3 = vweird.f32 %v120_v39 }
 0x195   :  { %v133_v47 = vor.u32 1.1754944e-38, %v132_v43  ;;  %vm131_vm6 = vcmp.eq.f32.partialorder %v130_v45, 8.507059e+37 }
 0x199   :  { %v149_v40 = vpop.eup %148 }
 0x19a   :  { %v122_v41 = vmul.f32 %v149_v40, %v120_v39  ;;  %vm127_vm2 = vweird.f32 %v149_v40 }
 0x19b   :  { %vm128_vm4 = vmor %vm126_vm3, %vm127_vm2 }
 0x19c   :  { %v123_v42 = vsub.f32 1.0, %v122_v41 }
 0x19e   :  { %v124_v44 = vmul.f32 %v149_v40, %v123_v42 }
 0x1a0   :  { %v125_v46 = vadd.f32 %v149_v40, %v124_v44 }
 0x1a2   :  { %v129_v48 = vsel %vm128_vm4, %v149_v40, %v125_v46 }
 0x1a3   :  { %v134_v49 = vsel %vm131_vm6, %v133_v47, %v129_v48 }
 0x1a4   :  { %136 = vst.msk [vmem:[%s275_s7] sm:$0xff] %vm135_vm5, %v134_v49 }

</bundles_post_ra>
